<compile_context>
chip_gen: v6e
topology: v6e:2x2x1
jax: 0.10.0
libtpu: 0.0.40
codegen_flags: <defaults>
</compile_context>

<pallas_src>
import functools

import jax
import jax.numpy as jnp
from jax.experimental import pallas as pl
from jax.experimental.pallas import tpu as pltpu


def embed_gather_kernel(tokens_ref, w_e_ref, o_ref, sem, *, tokens_per_block):
    """Gather `tokens_per_block` rows of W_E (HBM) into one output VMEM block.

    tokens_ref : SMEM  int32[num_tokens_padded]        (scalar-prefetched ids)
    w_e_ref    : HBM   [d_vocab, d_model]               (memory_space=pl.ANY)
    o_ref      : VMEM  [tokens_per_block, d_model]      (current output block)
    sem        : DMA semaphores, one per in-flight row copy
    """
    i = pl.program_id(0)
    base = i * tokens_per_block

    def row_copy(j):
        tok = tokens_ref[base + j]                       # scalar read from SMEM
        return pltpu.make_async_copy(
            w_e_ref.at[pl.ds(tok, 1), :],                # one (1, d_model) row in HBM
            o_ref.at[pl.ds(j, 1), :],                    # straight into the output block
            sem.at[j])

    # Issue every row DMA for this tile (they run concurrently), then wait.
    # tokens_per_block is a small static constant, so these loops fully unroll.
    for j in range(tokens_per_block):
        row_copy(j).start()
    for j in range(tokens_per_block):
        row_copy(j).wait()
    # TODO(synk): for real serving workloads, coalesce runs of identical /
    # contiguous token ids into single multi-row DMAs to cut descriptor count.


def embed_forward(tokens, W_E, *, tokens_per_block=8):
    """Pallas equivalent of `Embed.forward`: returns W_E[tokens]."""
    batch, seq = tokens.shape
    d_vocab, d_model = W_E.shape
    n = batch * seq
    n_pad = pl.cdiv(n, tokens_per_block) * tokens_per_block

    flat = tokens.reshape(n).astype(jnp.int32)
    if n_pad != n:
        # Pad with a valid id (0); padded rows are discarded below.
        flat = jnp.concatenate([flat, jnp.zeros((n_pad - n,), jnp.int32)])

    kernel = functools.partial(embed_gather_kernel,
                               tokens_per_block=tokens_per_block)

    out_flat = pl.pallas_call(
        kernel,
        out_shape=jax.ShapeDtypeStruct((n_pad, d_model), W_E.dtype),
        grid_spec=pltpu.PrefetchScalarGridSpec(
            num_scalar_prefetch=1,                       # token ids -> SMEM
            grid=(n_pad // tokens_per_block,),
            in_specs=[pl.BlockSpec(memory_space=pl.ANY)],  # W_E stays in HBM
            out_specs=pl.BlockSpec((tokens_per_block, d_model),
                                   lambda i, tok: (i, 0)),
            scratch_shapes=[pltpu.SemaphoreType.DMA((tokens_per_block,))],
        ),
        compiler_params=pltpu.CompilerParams(
            dimension_semantics=("parallel",)),          # shard tiles across TCs
    )(flat, W_E)

    return out_flat[:n].reshape(batch, seq, d_model)


def embed_ref(tokens, W_E):
    """Plain-JAX reference mirroring the PyTorch Embed.forward."""
    return jnp.take(W_E, tokens, axis=0)


if __name__ == "__main__":
    # Small shapes consistent with the module (scaled-down GPT-2 config).
    # d_model=128 keeps the demo output slab lane-dense; at real size (768) the
    # same property holds automatically.
    batch, seq, d_vocab, d_model = 2, 8, 512, 128
    init_range = 0.02

    key = jax.random.PRNGKey(0)
    k_tok, k_we = jax.random.split(key)
    tokens = jax.random.randint(k_tok, (batch, seq), 0, d_vocab, jnp.int32)
    W_E = jax.random.normal(k_we, (d_vocab, d_model), jnp.float32) * init_range

    out = embed_forward(tokens, W_E)
    out = jax.block_until_ready(out)

    ref = embed_ref(tokens, W_E)
    assert out.shape == (batch, seq, d_model)
    assert jnp.array_equal(out, ref), "mismatch vs reference"

    print("KERNEL_OK")
</pallas_src>

<mosaic_0001>
module attributes {stable_mosaic.version = 11 : i64} {
  func.func @embed_gather_kernel(%arg0: i32, %arg1: memref<16xi32, #tpu.memory_space<smem>>, %arg2: memref<512x128xf32, #tpu.memory_space<any>>, %arg3: memref<8x128xf32, #tpu.memory_space<vmem>>, %arg4: memref<8x!tpu.dma_semaphore, #tpu.memory_space<semaphore_mem>>) attributes {dimension_semantics = [#tpu.dimension_semantics<parallel>], iteration_bounds = array<i64: 2>, scalar_prefetch = 1 : i64, scratch_operands = 1 : i64, tpu.core_type = #tpu.core_type<tc>, window_params = [{}, {transform_indices = @transform_1, window_bounds = array<i64: 8, 128>}]} {
    %c8_i32 = arith.constant 8 : i32
    %0 = arith.muli %arg0, %c8_i32 : i32
    %c0_i32 = arith.constant 0 : i32
    %1 = arith.addi %0, %c0_i32 : i32
    %2 = arith.index_cast %1 : i32 to index
    %3 = memref.load %arg1[%2] : memref<16xi32, #tpu.memory_space<smem>>
    %c0_i32_0 = arith.constant 0 : i32
    %c0_i32_1 = arith.constant 0 : i32
    %4 = tpu.memref_slice %arg2[%3, %c0_i32_1] : memref<512x128xf32, #tpu.memory_space<any>> -> memref<1x128xf32, #tpu.memory_space<any>>
    %c0_i32_2 = arith.constant 0 : i32
    %c0_i32_3 = arith.constant 0 : i32
    %5 = tpu.memref_slice %arg3[%c0_i32_2, %c0_i32_3] : memref<8x128xf32, #tpu.memory_space<vmem>> -> memref<1x128xf32, #tpu.memory_space<vmem>>
    %6 = tpu.memref_slice %arg4[%c0_i32_0] : memref<8x!tpu.dma_semaphore, #tpu.memory_space<semaphore_mem>> -> memref<1x!tpu.dma_semaphore, #tpu.memory_space<semaphore_mem>>
    %7 = tpu.memref_squeeze %6 : memref<1x!tpu.dma_semaphore, #tpu.memory_space<semaphore_mem>> -> memref<!tpu.dma_semaphore, #tpu.memory_space<semaphore_mem>>
    tpu.enqueue_dma source(%4 : memref<1x128xf32, #tpu.memory_space<any>>) target(%5 : memref<1x128xf32, #tpu.memory_space<vmem>>) target_semaphore(%7 : memref<!tpu.dma_semaphore, #tpu.memory_space<semaphore_mem>>)
    %c1_i32 = arith.constant 1 : i32
    %8 = arith.addi %0, %c1_i32 : i32
    %9 = arith.index_cast %8 : i32 to index
    %10 = memref.load %arg1[%9] : memref<16xi32, #tpu.memory_space<smem>>
    %c1_i32_4 = arith.constant 1 : i32
    %c0_i32_5 = arith.constant 0 : i32
    %11 = tpu.memref_slice %arg2[%10, %c0_i32_5] : memref<512x128xf32, #tpu.memory_space<any>> -> memref<1x128xf32, #tpu.memory_space<any>>
    %c1_i32_6 = arith.constant 1 : i32
    %c0_i32_7 = arith.constant 0 : i32
    %12 = tpu.memref_slice %arg3[%c1_i32_6, %c0_i32_7] : memref<8x128xf32, #tpu.memory_space<vmem>> -> memref<1x128xf32, #tpu.memory_space<vmem>>
    %13 = tpu.memref_slice %arg4[%c1_i32_4] : memref<8x!tpu.dma_semaphore, #tpu.memory_space<semaphore_mem>> -> memref<1x!tpu.dma_semaphore, #tpu.memory_space<semaphore_mem>>
    %14 = tpu.memref_squeeze %13 : memref<1x!tpu.dma_semaphore, #tpu.memory_space<semaphore_mem>> -> memref<!tpu.dma_semaphore, #tpu.memory_space<semaphore_mem>>
    tpu.enqueue_dma source(%11 : memref<1x128xf32, #tpu.memory_space<any>>) target(%12 : memref<1x128xf32, #tpu.memory_space<vmem>>) target_semaphore(%14 : memref<!tpu.dma_semaphore, #tpu.memory_space<semaphore_mem>>)
    %c2_i32 = arith.constant 2 : i32
    %15 = arith.addi %0, %c2_i32 : i32
    %16 = arith.index_cast %15 : i32 to index
    %17 = memref.load %arg1[%16] : memref<16xi32, #tpu.memory_space<smem>>
    %c2_i32_8 = arith.constant 2 : i32
    %c0_i32_9 = arith.constant 0 : i32
    %18 = tpu.memref_slice %arg2[%17, %c0_i32_9] : memref<512x128xf32, #tpu.memory_space<any>> -> memref<1x128xf32, #tpu.memory_space<any>>
    %c2_i32_10 = arith.constant 2 : i32
    %c0_i32_11 = arith.constant 0 : i32
    %19 = tpu.memref_slice %arg3[%c2_i32_10, %c0_i32_11] : memref<8x128xf32, #tpu.memory_space<vmem>> -> memref<1x128xf32, #tpu.memory_space<vmem>>
    %20 = tpu.memref_slice %arg4[%c2_i32_8] : memref<8x!tpu.dma_semaphore, #tpu.memory_space<semaphore_mem>> -> memref<1x!tpu.dma_semaphore, #tpu.memory_space<semaphore_mem>>
    %21 = tpu.memref_squeeze %20 : memref<1x!tpu.dma_semaphore, #tpu.memory_space<semaphore_mem>> -> memref<!tpu.dma_semaphore, #tpu.memory_space<semaphore_mem>>
    tpu.enqueue_dma source(%18 : memref<1x128xf32, #tpu.memory_space<any>>) target(%19 : memref<1x128xf32, #tpu.memory_space<vmem>>) target_semaphore(%21 : memref<!tpu.dma_semaphore, #tpu.memory_space<semaphore_mem>>)
    %c3_i32 = arith.constant 3 : i32
    %22 = arith.addi %0, %c3_i32 : i32
    %23 = arith.index_cast %22 : i32 to index
    %24 = memref.load %arg1[%23] : memref<16xi32, #tpu.memory_space<smem>>
    %c3_i32_12 = arith.constant 3 : i32
    %c0_i32_13 = arith.constant 0 : i32
    %25 = tpu.memref_slice %arg2[%24, %c0_i32_13] : memref<512x128xf32, #tpu.memory_space<any>> -> memref<1x128xf32, #tpu.memory_space<any>>
    %c3_i32_14 = arith.constant 3 : i32
    %c0_i32_15 = arith.constant 0 : i32
    %26 = tpu.memref_slice %arg3[%c3_i32_14, %c0_i32_15] : memref<8x128xf32, #tpu.memory_space<vmem>> -> memref<1x128xf32, #tpu.memory_space<vmem>>
    %27 = tpu.memref_slice %arg4[%c3_i32_12] : memref<8x!tpu.dma_semaphore, #tpu.memory_space<semaphore_mem>> -> memref<1x!tpu.dma_semaphore, #tpu.memory_space<semaphore_mem>>
    %28 = tpu.memref_squeeze %27 : memref<1x!tpu.dma_semaphore, #tpu.memory_space<semaphore_mem>> -> memref<!tpu.dma_semaphore, #tpu.memory_space<semaphore_mem>>
    tpu.enqueue_dma source(%25 : memref<1x128xf32, #tpu.memory_space<any>>) target(%26 : memref<1x128xf32, #tpu.memory_space<vmem>>) target_semaphore(%28 : memref<!tpu.dma_semaphore, #tpu.memory_space<semaphore_mem>>)
    %c4_i32 = arith.constant 4 : i32
    %29 = arith.addi %0, %c4_i32 : i32
    %30 = arith.index_cast %29 : i32 to index
    %31 = memref.load %arg1[%30] : memref<16xi32, #tpu.memory_space<smem>>
    %c4_i32_16 = arith.constant 4 : i32
    %c0_i32_17 = arith.constant 0 : i32
    %32 = tpu.memref_slice %arg2[%31, %c0_i32_17] : memref<512x128xf32, #tpu.memory_space<any>> -> memref<1x128xf32, #tpu.memory_space<any>>
    %c4_i32_18 = arith.constant 4 : i32
    %c0_i32_19 = arith.constant 0 : i32
    %33 = tpu.memref_slice %arg3[%c4_i32_18, %c0_i32_19] : memref<8x128xf32, #tpu.memory_space<vmem>> -> memref<1x128xf32, #tpu.memory_space<vmem>>
    %34 = tpu.memref_slice %arg4[%c4_i32_16] : memref<8x!tpu.dma_semaphore, #tpu.memory_space<semaphore_mem>> -> memref<1x!tpu.dma_semaphore, #tpu.memory_space<semaphore_mem>>
    %35 = tpu.memref_squeeze %34 : memref<1x!tpu.dma_semaphore, #tpu.memory_space<semaphore_mem>> -> memref<!tpu.dma_semaphore, #tpu.memory_space<semaphore_mem>>
    tpu.enqueue_dma source(%32 : memref<1x128xf32, #tpu.memory_space<any>>) target(%33 : memref<1x128xf32, #tpu.memory_space<vmem>>) target_semaphore(%35 : memref<!tpu.dma_semaphore, #tpu.memory_space<semaphore_mem>>)
    %c5_i32 = arith.constant 5 : i32
    %36 = arith.addi %0, %c5_i32 : i32
    %37 = arith.index_cast %36 : i32 to index
    %38 = memref.load %arg1[%37] : memref<16xi32, #tpu.memory_space<smem>>
    %c5_i32_20 = arith.constant 5 : i32
    %c0_i32_21 = arith.constant 0 : i32
    %39 = tpu.memref_slice %arg2[%38, %c0_i32_21] : memref<512x128xf32, #tpu.memory_space<any>> -> memref<1x128xf32, #tpu.memory_space<any>>
    %c5_i32_22 = arith.constant 5 : i32
    %c0_i32_23 = arith.constant 0 : i32
    %40 = tpu.memref_slice %arg3[%c5_i32_22, %c0_i32_23] : memref<8x128xf32, #tpu.memory_space<vmem>> -> memref<1x128xf32, #tpu.memory_space<vmem>>
    %41 = tpu.memref_slice %arg4[%c5_i32_20] : memref<8x!tpu.dma_semaphore, #tpu.memory_space<semaphore_mem>> -> memref<1x!tpu.dma_semaphore, #tpu.memory_space<semaphore_mem>>
    %42 = tpu.memref_squeeze %41 : memref<1x!tpu.dma_semaphore, #tpu.memory_space<semaphore_mem>> -> memref<!tpu.dma_semaphore, #tpu.memory_space<semaphore_mem>>
    tpu.enqueue_dma source(%39 : memref<1x128xf32, #tpu.memory_space<any>>) target(%40 : memref<1x128xf32, #tpu.memory_space<vmem>>) target_semaphore(%42 : memref<!tpu.dma_semaphore, #tpu.memory_space<semaphore_mem>>)
    %c6_i32 = arith.constant 6 : i32
    %43 = arith.addi %0, %c6_i32 : i32
    %44 = arith.index_cast %43 : i32 to index
    %45 = memref.load %arg1[%44] : memref<16xi32, #tpu.memory_space<smem>>
    %c6_i32_24 = arith.constant 6 : i32
    %c0_i32_25 = arith.constant 0 : i32
    %46 = tpu.memref_slice %arg2[%45, %c0_i32_25] : memref<512x128xf32, #tpu.memory_space<any>> -> memref<1x128xf32, #tpu.memory_space<any>>
    %c6_i32_26 = arith.constant 6 : i32
    %c0_i32_27 = arith.constant 0 : i32
    %47 = tpu.memref_slice %arg3[%c6_i32_26, %c0_i32_27] : memref<8x128xf32, #tpu.memory_space<vmem>> -> memref<1x128xf32, #tpu.memory_space<vmem>>
    %48 = tpu.memref_slice %arg4[%c6_i32_24] : memref<8x!tpu.dma_semaphore, #tpu.memory_space<semaphore_mem>> -> memref<1x!tpu.dma_semaphore, #tpu.memory_space<semaphore_mem>>
    %49 = tpu.memref_squeeze %48 : memref<1x!tpu.dma_semaphore, #tpu.memory_space<semaphore_mem>> -> memref<!tpu.dma_semaphore, #tpu.memory_space<semaphore_mem>>
    tpu.enqueue_dma source(%46 : memref<1x128xf32, #tpu.memory_space<any>>) target(%47 : memref<1x128xf32, #tpu.memory_space<vmem>>) target_semaphore(%49 : memref<!tpu.dma_semaphore, #tpu.memory_space<semaphore_mem>>)
    %c7_i32 = arith.constant 7 : i32
    %50 = arith.addi %0, %c7_i32 : i32
    %51 = arith.index_cast %50 : i32 to index
    %52 = memref.load %arg1[%51] : memref<16xi32, #tpu.memory_space<smem>>
    %c7_i32_28 = arith.constant 7 : i32
    %c0_i32_29 = arith.constant 0 : i32
    %53 = tpu.memref_slice %arg2[%52, %c0_i32_29] : memref<512x128xf32, #tpu.memory_space<any>> -> memref<1x128xf32, #tpu.memory_space<any>>
    %c7_i32_30 = arith.constant 7 : i32
    %c0_i32_31 = arith.constant 0 : i32
    %54 = tpu.memref_slice %arg3[%c7_i32_30, %c0_i32_31] : memref<8x128xf32, #tpu.memory_space<vmem>> -> memref<1x128xf32, #tpu.memory_space<vmem>>
    %55 = tpu.memref_slice %arg4[%c7_i32_28] : memref<8x!tpu.dma_semaphore, #tpu.memory_space<semaphore_mem>> -> memref<1x!tpu.dma_semaphore, #tpu.memory_space<semaphore_mem>>
    %56 = tpu.memref_squeeze %55 : memref<1x!tpu.dma_semaphore, #tpu.memory_space<semaphore_mem>> -> memref<!tpu.dma_semaphore, #tpu.memory_space<semaphore_mem>>
    tpu.enqueue_dma source(%53 : memref<1x128xf32, #tpu.memory_space<any>>) target(%54 : memref<1x128xf32, #tpu.memory_space<vmem>>) target_semaphore(%56 : memref<!tpu.dma_semaphore, #tpu.memory_space<semaphore_mem>>)
    %c0_i32_32 = arith.constant 0 : i32
    %57 = arith.addi %0, %c0_i32_32 : i32
    %58 = arith.index_cast %57 : i32 to index
    %59 = memref.load %arg1[%58] : memref<16xi32, #tpu.memory_space<smem>>
    %c0_i32_33 = arith.constant 0 : i32
    %c0_i32_34 = arith.constant 0 : i32
    %60 = tpu.memref_slice %arg2[%59, %c0_i32_34] : memref<512x128xf32, #tpu.memory_space<any>> -> memref<1x128xf32, #tpu.memory_space<any>>
    %c0_i32_35 = arith.constant 0 : i32
    %c0_i32_36 = arith.constant 0 : i32
    %61 = tpu.memref_slice %arg3[%c0_i32_35, %c0_i32_36] : memref<8x128xf32, #tpu.memory_space<vmem>> -> memref<1x128xf32, #tpu.memory_space<vmem>>
    %62 = tpu.memref_slice %arg4[%c0_i32_33] : memref<8x!tpu.dma_semaphore, #tpu.memory_space<semaphore_mem>> -> memref<1x!tpu.dma_semaphore, #tpu.memory_space<semaphore_mem>>
    %63 = tpu.memref_squeeze %62 : memref<1x!tpu.dma_semaphore, #tpu.memory_space<semaphore_mem>> -> memref<!tpu.dma_semaphore, #tpu.memory_space<semaphore_mem>>
    tpu.wait_dma2 semaphore(%63 : memref<!tpu.dma_semaphore, #tpu.memory_space<semaphore_mem>>) src(%60 : memref<1x128xf32, #tpu.memory_space<any>>) dst(%61 : memref<1x128xf32, #tpu.memory_space<vmem>>)
    %c1_i32_37 = arith.constant 1 : i32
    %64 = arith.addi %0, %c1_i32_37 : i32
    %65 = arith.index_cast %64 : i32 to index
    %66 = memref.load %arg1[%65] : memref<16xi32, #tpu.memory_space<smem>>
    %c1_i32_38 = arith.constant 1 : i32
    %c0_i32_39 = arith.constant 0 : i32
    %67 = tpu.memref_slice %arg2[%66, %c0_i32_39] : memref<512x128xf32, #tpu.memory_space<any>> -> memref<1x128xf32, #tpu.memory_space<any>>
    %c1_i32_40 = arith.constant 1 : i32
    %c0_i32_41 = arith.constant 0 : i32
    %68 = tpu.memref_slice %arg3[%c1_i32_40, %c0_i32_41] : memref<8x128xf32, #tpu.memory_space<vmem>> -> memref<1x128xf32, #tpu.memory_space<vmem>>
    %69 = tpu.memref_slice %arg4[%c1_i32_38] : memref<8x!tpu.dma_semaphore, #tpu.memory_space<semaphore_mem>> -> memref<1x!tpu.dma_semaphore, #tpu.memory_space<semaphore_mem>>
    %70 = tpu.memref_squeeze %69 : memref<1x!tpu.dma_semaphore, #tpu.memory_space<semaphore_mem>> -> memref<!tpu.dma_semaphore, #tpu.memory_space<semaphore_mem>>
    tpu.wait_dma2 semaphore(%70 : memref<!tpu.dma_semaphore, #tpu.memory_space<semaphore_mem>>) src(%67 : memref<1x128xf32, #tpu.memory_space<any>>) dst(%68 : memref<1x128xf32, #tpu.memory_space<vmem>>)
    %c2_i32_42 = arith.constant 2 : i32
    %71 = arith.addi %0, %c2_i32_42 : i32
    %72 = arith.index_cast %71 : i32 to index
    %73 = memref.load %arg1[%72] : memref<16xi32, #tpu.memory_space<smem>>
    %c2_i32_43 = arith.constant 2 : i32
    %c0_i32_44 = arith.constant 0 : i32
    %74 = tpu.memref_slice %arg2[%73, %c0_i32_44] : memref<512x128xf32, #tpu.memory_space<any>> -> memref<1x128xf32, #tpu.memory_space<any>>
    %c2_i32_45 = arith.constant 2 : i32
    %c0_i32_46 = arith.constant 0 : i32
    %75 = tpu.memref_slice %arg3[%c2_i32_45, %c0_i32_46] : memref<8x128xf32, #tpu.memory_space<vmem>> -> memref<1x128xf32, #tpu.memory_space<vmem>>
    %76 = tpu.memref_slice %arg4[%c2_i32_43] : memref<8x!tpu.dma_semaphore, #tpu.memory_space<semaphore_mem>> -> memref<1x!tpu.dma_semaphore, #tpu.memory_space<semaphore_mem>>
    %77 = tpu.memref_squeeze %76 : memref<1x!tpu.dma_semaphore, #tpu.memory_space<semaphore_mem>> -> memref<!tpu.dma_semaphore, #tpu.memory_space<semaphore_mem>>
    tpu.wait_dma2 semaphore(%77 : memref<!tpu.dma_semaphore, #tpu.memory_space<semaphore_mem>>) src(%74 : memref<1x128xf32, #tpu.memory_space<any>>) dst(%75 : memref<1x128xf32, #tpu.memory_space<vmem>>)
    %c3_i32_47 = arith.constant 3 : i32
    %78 = arith.addi %0, %c3_i32_47 : i32
    %79 = arith.index_cast %78 : i32 to index
    %80 = memref.load %arg1[%79] : memref<16xi32, #tpu.memory_space<smem>>
    %c3_i32_48 = arith.constant 3 : i32
    %c0_i32_49 = arith.constant 0 : i32
    %81 = tpu.memref_slice %arg2[%80, %c0_i32_49] : memref<512x128xf32, #tpu.memory_space<any>> -> memref<1x128xf32, #tpu.memory_space<any>>
    %c3_i32_50 = arith.constant 3 : i32
    %c0_i32_51 = arith.constant 0 : i32
    %82 = tpu.memref_slice %arg3[%c3_i32_50, %c0_i32_51] : memref<8x128xf32, #tpu.memory_space<vmem>> -> memref<1x128xf32, #tpu.memory_space<vmem>>
    %83 = tpu.memref_slice %arg4[%c3_i32_48] : memref<8x!tpu.dma_semaphore, #tpu.memory_space<semaphore_mem>> -> memref<1x!tpu.dma_semaphore, #tpu.memory_space<semaphore_mem>>
    %84 = tpu.memref_squeeze %83 : memref<1x!tpu.dma_semaphore, #tpu.memory_space<semaphore_mem>> -> memref<!tpu.dma_semaphore, #tpu.memory_space<semaphore_mem>>
    tpu.wait_dma2 semaphore(%84 : memref<!tpu.dma_semaphore, #tpu.memory_space<semaphore_mem>>) src(%81 : memref<1x128xf32, #tpu.memory_space<any>>) dst(%82 : memref<1x128xf32, #tpu.memory_space<vmem>>)
    %c4_i32_52 = arith.constant 4 : i32
    %85 = arith.addi %0, %c4_i32_52 : i32
    %86 = arith.index_cast %85 : i32 to index
    %87 = memref.load %arg1[%86] : memref<16xi32, #tpu.memory_space<smem>>
    %c4_i32_53 = arith.constant 4 : i32
    %c0_i32_54 = arith.constant 0 : i32
    %88 = tpu.memref_slice %arg2[%87, %c0_i32_54] : memref<512x128xf32, #tpu.memory_space<any>> -> memref<1x128xf32, #tpu.memory_space<any>>
    %c4_i32_55 = arith.constant 4 : i32
    %c0_i32_56 = arith.constant 0 : i32
    %89 = tpu.memref_slice %arg3[%c4_i32_55, %c0_i32_56] : memref<8x128xf32, #tpu.memory_space<vmem>> -> memref<1x128xf32, #tpu.memory_space<vmem>>
    %90 = tpu.memref_slice %arg4[%c4_i32_53] : memref<8x!tpu.dma_semaphore, #tpu.memory_space<semaphore_mem>> -> memref<1x!tpu.dma_semaphore, #tpu.memory_space<semaphore_mem>>
    %91 = tpu.memref_squeeze %90 : memref<1x!tpu.dma_semaphore, #tpu.memory_space<semaphore_mem>> -> memref<!tpu.dma_semaphore, #tpu.memory_space<semaphore_mem>>
    tpu.wait_dma2 semaphore(%91 : memref<!tpu.dma_semaphore, #tpu.memory_space<semaphore_mem>>) src(%88 : memref<1x128xf32, #tpu.memory_space<any>>) dst(%89 : memref<1x128xf32, #tpu.memory_space<vmem>>)
    %c5_i32_57 = arith.constant 5 : i32
    %92 = arith.addi %0, %c5_i32_57 : i32
    %93 = arith.index_cast %92 : i32 to index
    %94 = memref.load %arg1[%93] : memref<16xi32, #tpu.memory_space<smem>>
    %c5_i32_58 = arith.constant 5 : i32
    %c0_i32_59 = arith.constant 0 : i32
    %95 = tpu.memref_slice %arg2[%94, %c0_i32_59] : memref<512x128xf32, #tpu.memory_space<any>> -> memref<1x128xf32, #tpu.memory_space<any>>
    %c5_i32_60 = arith.constant 5 : i32
    %c0_i32_61 = arith.constant 0 : i32
    %96 = tpu.memref_slice %arg3[%c5_i32_60, %c0_i32_61] : memref<8x128xf32, #tpu.memory_space<vmem>> -> memref<1x128xf32, #tpu.memory_space<vmem>>
    %97 = tpu.memref_slice %arg4[%c5_i32_58] : memref<8x!tpu.dma_semaphore, #tpu.memory_space<semaphore_mem>> -> memref<1x!tpu.dma_semaphore, #tpu.memory_space<semaphore_mem>>
    %98 = tpu.memref_squeeze %97 : memref<1x!tpu.dma_semaphore, #tpu.memory_space<semaphore_mem>> -> memref<!tpu.dma_semaphore, #tpu.memory_space<semaphore_mem>>
    tpu.wait_dma2 semaphore(%98 : memref<!tpu.dma_semaphore, #tpu.memory_space<semaphore_mem>>) src(%95 : memref<1x128xf32, #tpu.memory_space<any>>) dst(%96 : memref<1x128xf32, #tpu.memory_space<vmem>>)
    %c6_i32_62 = arith.constant 6 : i32
    %99 = arith.addi %0, %c6_i32_62 : i32
    %100 = arith.index_cast %99 : i32 to index
    %101 = memref.load %arg1[%100] : memref<16xi32, #tpu.memory_space<smem>>
    %c6_i32_63 = arith.constant 6 : i32
    %c0_i32_64 = arith.constant 0 : i32
    %102 = tpu.memref_slice %arg2[%101, %c0_i32_64] : memref<512x128xf32, #tpu.memory_space<any>> -> memref<1x128xf32, #tpu.memory_space<any>>
    %c6_i32_65 = arith.constant 6 : i32
    %c0_i32_66 = arith.constant 0 : i32
    %103 = tpu.memref_slice %arg3[%c6_i32_65, %c0_i32_66] : memref<8x128xf32, #tpu.memory_space<vmem>> -> memref<1x128xf32, #tpu.memory_space<vmem>>
    %104 = tpu.memref_slice %arg4[%c6_i32_63] : memref<8x!tpu.dma_semaphore, #tpu.memory_space<semaphore_mem>> -> memref<1x!tpu.dma_semaphore, #tpu.memory_space<semaphore_mem>>
    %105 = tpu.memref_squeeze %104 : memref<1x!tpu.dma_semaphore, #tpu.memory_space<semaphore_mem>> -> memref<!tpu.dma_semaphore, #tpu.memory_space<semaphore_mem>>
    tpu.wait_dma2 semaphore(%105 : memref<!tpu.dma_semaphore, #tpu.memory_space<semaphore_mem>>) src(%102 : memref<1x128xf32, #tpu.memory_space<any>>) dst(%103 : memref<1x128xf32, #tpu.memory_space<vmem>>)
    %c7_i32_67 = arith.constant 7 : i32
    %106 = arith.addi %0, %c7_i32_67 : i32
    %107 = arith.index_cast %106 : i32 to index
    %108 = memref.load %arg1[%107] : memref<16xi32, #tpu.memory_space<smem>>
    %c7_i32_68 = arith.constant 7 : i32
    %c0_i32_69 = arith.constant 0 : i32
    %109 = tpu.memref_slice %arg2[%108, %c0_i32_69] : memref<512x128xf32, #tpu.memory_space<any>> -> memref<1x128xf32, #tpu.memory_space<any>>
    %c7_i32_70 = arith.constant 7 : i32
    %c0_i32_71 = arith.constant 0 : i32
    %110 = tpu.memref_slice %arg3[%c7_i32_70, %c0_i32_71] : memref<8x128xf32, #tpu.memory_space<vmem>> -> memref<1x128xf32, #tpu.memory_space<vmem>>
    %111 = tpu.memref_slice %arg4[%c7_i32_68] : memref<8x!tpu.dma_semaphore, #tpu.memory_space<semaphore_mem>> -> memref<1x!tpu.dma_semaphore, #tpu.memory_space<semaphore_mem>>
    %112 = tpu.memref_squeeze %111 : memref<1x!tpu.dma_semaphore, #tpu.memory_space<semaphore_mem>> -> memref<!tpu.dma_semaphore, #tpu.memory_space<semaphore_mem>>
    tpu.wait_dma2 semaphore(%112 : memref<!tpu.dma_semaphore, #tpu.memory_space<semaphore_mem>>) src(%109 : memref<1x128xf32, #tpu.memory_space<any>>) dst(%110 : memref<1x128xf32, #tpu.memory_space<vmem>>)
    return
  }
  func.func @transform_1(%arg0: i32, %arg1: memref<16xi32, #tpu.memory_space<smem>>) -> (i32, i32) {
    %c0_i32 = arith.constant 0 : i32
    %c0_i32_0 = arith.constant 0 : i32
    return %arg0, %c0_i32 : i32, i32
  }
}

</mosaic_0001>

<bundles_post_ra>
// kernel: tpu_custom_call.1
= control target key start
LH: loop header
LB: loop body
LE: loop exit
PB: predicated region body
PF: predicated region fallthrough
CT: control target
= control target key end

     0   :  { %s739_s9 = smov [#allocation4]   ;;  %s1108_s0 = inlined_call_operand.hbm [shape: s32[16], index: 0, kind: input, shape index: {}]   ;;  %s1109_s1 = inlined_call_operand.hbm [shape: f32[512,128], index: 1, kind: input, shape index: {}]   ;;  %s1110_s2 = inlined_call_operand.hbm [shape: f32[16,128], index: 2, kind: output, shape index: {}]  }
   0x1   :  { %8 = dma.hbm_to_smem %s1108_s0, 16, %s739_s9, [#allocation3] }
   0x2   :  { %689 = dma.done.wait [#allocation3], 16 }
   0x3   :  { %690 = vsyncadd [#allocation3], 4294967280 }
   0x4   :  { %10 = sfence }
   0x5   :  { %11 = vsyncpa [#allocation6], 0 }
   0x6   :  { %13 = vsyncpa [#allocation6 + $0x1], 0  ;;  %s759_s12 = smov 0   ;;  %s761_s13 = smov 0  }
   0x7   :  { %s763_s14 = smov 0  }
   0x8 LB: > { %s339_s0 = sadd.s32 4294967295, %s737_s14   ;;  %s776_s15 = sadd.s32 1, %s737_s14   ;;  %s737_s14 = sphi %s763_s14, %s1120_s14   ;;  %s733_s13 = sphi %s761_s13, %s1119_s13   ;;  %s729_s12 = sphi %s759_s12, %s1118_s12  }
   0x9   : > { %s22_s16 = ssub.s32 %s737_s14, %s776_s15  ;;  %s25_s17 = sadd.s32 1, %s733_s13 }
   0xa   : > { %p23_p0 = scmp.eq.s32.totalorder %s22_s16, 0  ;;  %p340_p1 = scmp.ne.s32.totalorder %s22_s16, 0 }
   0xb   : > { %p29_p2 = scmp.eq.s32.totalorder %s737_s14, 1  ;;  %p34_p3 = scmp.ne.s32.totalorder %s733_s13, %s729_s12 }
   0xc   : > { %s785_s18 = scalar_select %p23_p0, %s733_s13, %s25_s17  }
   0xd   : > { %p787_p4 = por %p340_p1, %p29_p2  ;;  %p35_p5 = scmp.eq.s32.totalorder %s339_s0, 1 }
   0xe   : > { %p406_p6 = scmp.lt.s32.totalorder %s737_s14, 2  ;;  %s49_s21 = sand.u32 1, %s733_s13  }
   0xf   : > { %p792_p7 = por %p35_p5, %p34_p3  ;;  %s342_s22 = sshll.u32 %s49_s21, 3 }
  0x10   : > { %s800_s23 = sshll.u32 %s737_s14, 3  ;;  %s808_s27 = scalar_lea.vmem [#allocation5], %s342_s22 }
  0x11   : > { %s1113_s20 = scalar_select %p792_p7, 1, 0 }
  0x12   : > { %s67_s24 = sadd.s32 1, %s800_s23  ;;  %s63_s28 = sshll.u32 %s808_s27, 4  ;;  %s812_s28 = int_to_ptr.vmem [resolvable:$true] %s63_s28 }
  0x13   : > { %s367_s25 = scalar_select %p406_p6, [#allocation4], [#allocation25] }
  0x14   : > { %s368_s26 = scalar_select %p406_p6, %s800_s23, 0 }
  0x15   : > { %s71_s29 = scalar_lea.vmem %s808_s27, 1 [#allocation5]  ;;  %s1122_s24 = smov (!%p406_p6, %s67_s24), 0 }
  0x16   : > { %s53_s30 = sld [smem:[%s367_s25 + %s368_s26]]  ;;  %s80_s4 = sshll.u32 %s71_s29, 4  ;;  %s821_s4 = int_to_ptr.vmem [resolvable:$true] %s80_s4 }
  0x17   : > { %s370_s3 = scalar_select %p406_p6, [#allocation4], [#allocation26] }
  0x18   : > { %s84_s5 = sadd.s32 2, %s800_s23  ;;  %s88_s9 = scalar_lea.vmem %s808_s27, 2 [#allocation5] }
  0x19   : > { %s819_s6 = sld [smem:[%s370_s3 + %s1122_s24]]  ;;  %s97_s16 = sshll.u32 %s88_s9, 4  ;;  %s865_s16 = int_to_ptr.vmem [resolvable:$true] %s97_s16 }
  0x1a   : > { %s825_s7 = scalar_select %p406_p6, [#allocation4], [#allocation27] }
  0x1b   : > { %s836_s25 = scalar_lea.hbm %s1109_s1, 8192 }
  0x1c   : > { %s344_s8 = sshll.u32 %s53_s30, 4 }
  0x1d   : > { %s55_s0 = scalar_lea.hbm %s1109_s1, %s344_s8 }
  0x1e   : > { %s441_s17 = scalar_lea.hbm %s55_s0, 16  ;;  %p446_p11 = scmp.lt.s32.totalorder %s55_s0, %s1109_s1 }
  0x1f   : > { %p442_p8 = scmp.ne.s32.totalorder %s55_s0, %s441_s17  ;;  %p447_p12 = scmp.lt.s32.totalorder %s836_s25, %s441_s17 }
  0x21   : > { %p443_p9 = pnand %p442_p8, %p406_p6  ;;  %p448_p13 = por %p447_p12, %p446_p11 }
  0x23   : > { %p444_p10 = pneg %p443_p9 }
  0x25   : > { %p449_p0 = pnand %p448_p13, %p444_p10 }
  0x27   : > { %452 = shalt.err (!%p449_p0)  }
  0x28   : > { %s453_s30 = scalar_lea.vmem %s812_s28, 16  ;;  %s740_s3 = smov [#allocation5]  }
  0x29   : > { %p454_p1 = scmp.ne.s32.totalorder %s812_s28, %s453_s30  ;;  %s457_s8 = sshll.u32 %s740_s3, 4  ;;  %s846_s8 = int_to_ptr.vmem [resolvable:$false] %s457_s8 }
  0x2a   : > { %s849_s9 = scalar_lea.vmem %s846_s8, 256  ;;  %p1111_p5 = scmp.lt.s32.totalorder %s812_s28, %s846_s8 }
  0x2b   : > { %p455_p2 = pnand %p454_p1, %p406_p6  ;;  %p461_p8 = scmp.lt.s32.totalorder %s849_s9, %s453_s30 }
  0x2d   : > { %p456_p3 = pneg %p455_p2  ;;  %p462_p9 = por %p461_p8, %p1111_p5 }
  0x2f   : > { %p463_p10 = pnand %p462_p9, %p456_p3 }
  0x31   : > { %466 = shalt.err (!%p463_p10)  }
  0x32   : > { %369 = dma.hbm_to_vmem [thread:$0]  (%p406_p6), %s55_s0, 16, %s812_s28, [#allocation2] }
  0x33   : > { %s1124_s5 = smov (!%p406_p6, %s84_s5), 0  ;;  %s345_s10 = sshll.u32 %s819_s6, 4 }
  0x34   : > { %s70_s22 = scalar_lea.hbm %s1109_s1, %s345_s10  ;;  %s871_s24 = sld [smem:[%s825_s7 + %s1124_s5]] }
  0x35   : > { %s467_s26 = scalar_lea.hbm %s70_s22, 16  ;;  %p472_p0 = scmp.lt.s32.totalorder %s70_s22, %s1109_s1 }
  0x36   : > { %p468_p11 = scmp.ne.s32.totalorder %s70_s22, %s467_s26  ;;  %p473_p1 = scmp.lt.s32.totalorder %s836_s25, %s467_s26 }
  0x38   : > { %p469_p12 = pnand %p468_p11, %p406_p6  ;;  %p474_p2 = por %p473_p1, %p472_p0 }
  0x3a   : > { %p470_p13 = pneg %p469_p12 }
  0x3c   : > { %p475_p3 = pnand %p474_p2, %p470_p13 }
  0x3e   : > { %478 = shalt.err (!%p475_p3)  }
  0x3f   : > { %s479_s5 = scalar_lea.vmem %s821_s4, 16  ;;  %p486_p11 = scmp.lt.s32.totalorder %s821_s4, %s846_s8 }
  0x40   : > { %p480_p8 = scmp.ne.s32.totalorder %s821_s4, %s479_s5  ;;  %p487_p12 = scmp.lt.s32.totalorder %s849_s9, %s479_s5 }
  0x42   : > { %p481_p9 = pnand %p480_p8, %p406_p6  ;;  %p488_p5 = por %p487_p12, %p486_p11 }
  0x44   : > { %p482_p10 = pneg %p481_p9 }
  0x46   : > { %p489_p7 = pnand %p488_p5, %p482_p10 }
  0x48   : > { %492 = shalt.err (!%p489_p7)  }
  0x49   : > { %372 = dma.hbm_to_vmem [thread:$0]  (%p406_p6), %s70_s22, 16, %s821_s4, [#allocation2 + $0x1] }
  0x4a   : > { %s101_s6 = sadd.s32 3, %s800_s23  ;;  %s105_s7 = scalar_lea.vmem %s808_s27, 3 [#allocation5] }
  0x4b   : > { %s376_s0 = scalar_select %p406_p6, [#allocation4], [#allocation28] }
  0x4c   : > { %s1126_s6 = smov (!%p406_p6, %s101_s6), 0  ;;  %s114_s3 = sshll.u32 %s105_s7, 4  ;;  %s902_s3 = int_to_ptr.vmem [resolvable:$true] %s114_s3 }
  0x4d   : > { %s118_s10 = sadd.s32 4, %s800_s23  ;;  %s346_s11 = sshll.u32 %s871_s24, 4 }
  0x4e   : > { %s897_s17 = sld [smem:[%s376_s0 + %s1126_s6]]  ;;  %s87_s30 = scalar_lea.hbm %s1109_s1, %s346_s11 }
  0x4f   : > { %s493_s5 = scalar_lea.hbm %s87_s30, 16  ;;  %p498_p0 = scmp.lt.s32.totalorder %s87_s30, %s1109_s1 }
  0x50   : > { %p494_p7 = scmp.ne.s32.totalorder %s87_s30, %s493_s5  ;;  %p499_p1 = scmp.lt.s32.totalorder %s836_s25, %s493_s5 }
  0x52   : > { %p495_p5 = pnand %p494_p7, %p406_p6  ;;  %p500_p2 = por %p499_p1, %p498_p0 }
  0x54   : > { %p496_p13 = pneg %p495_p5 }
  0x56   : > { %p501_p3 = pnand %p500_p2, %p496_p13 }
  0x58   : > { %504 = shalt.err (!%p501_p3)  }
  0x59   : > { %s505_s24 = scalar_lea.vmem %s865_s16, 16  ;;  %p512_p11 = scmp.lt.s32.totalorder %s865_s16, %s846_s8 }
  0x5a   : > { %p506_p8 = scmp.ne.s32.totalorder %s865_s16, %s505_s24  ;;  %p513_p12 = scmp.lt.s32.totalorder %s849_s9, %s505_s24 }
  0x5c   : > { %p507_p9 = pnand %p506_p8, %p406_p6  ;;  %p514_p7 = por %p513_p12, %p512_p11 }
  0x5e   : > { %p508_p10 = pneg %p507_p9 }
  0x60   : > { %p515_p5 = pnand %p514_p7, %p508_p10 }
  0x62   : > { %518 = shalt.err (!%p515_p5)  }
  0x63   : > { %375 = dma.hbm_to_vmem [thread:$0]  (%p406_p6), %s87_s30, 16, %s865_s16, [#allocation2 + $0x2] }
  0x64   : > { %s379_s6 = scalar_select %p406_p6, [#allocation4], [#allocation29] }
  0x65   : > { %s1128_s10 = smov (!%p406_p6, %s118_s10), 0  ;;  %s122_s7 = scalar_lea.vmem %s808_s27, 4 [#allocation5] }
  0x66   : > { %s135_s0 = sadd.s32 5, %s800_s23  ;;  %s347_s11 = sshll.u32 %s897_s17, 4 }
  0x67   : > { %s927_s26 = sld [smem:[%s379_s6 + %s1128_s10]]  ;;  %s104_s4 = scalar_lea.hbm %s1109_s1, %s347_s11 }
  0x68   : > { %s131_s22 = sshll.u32 %s122_s7, 4  ;;  %s519_s24 = scalar_lea.hbm %s104_s4, 16  ;;  %s132_s22 = int_to_ptr.vmem [resolvable:$true] %s131_s22 }
  0x69   : > { %p520_p13 = scmp.ne.s32.totalorder %s104_s4, %s519_s24  ;;  %p524_p2 = scmp.lt.s32.totalorder %s104_s4, %s1109_s1 }
  0x6a   : > { %p525_p3 = scmp.lt.s32.totalorder %s836_s25, %s519_s24 }
  0x6b   : > { %p521_p0 = pnand %p520_p13, %p406_p6 }
  0x6c   : > { %p526_p8 = por %p525_p3, %p524_p2 }
  0x6d   : > { %p522_p1 = pneg %p521_p0 }
  0x6f   : > { %p527_p9 = pnand %p526_p8, %p522_p1 }
  0x71   : > { %530 = shalt.err (!%p527_p9)  }
  0x72   : > { %s531_s10 = scalar_lea.vmem %s902_s3, 16  ;;  %p538_p7 = scmp.lt.s32.totalorder %s902_s3, %s846_s8 }
  0x73   : > { %p532_p10 = scmp.ne.s32.totalorder %s902_s3, %s531_s10  ;;  %p539_p5 = scmp.lt.s32.totalorder %s849_s9, %s531_s10 }
  0x75   : > { %p533_p11 = pnand %p532_p10, %p406_p6  ;;  %p540_p13 = por %p539_p5, %p538_p7 }
  0x77   : > { %p534_p12 = pneg %p533_p11 }
  0x79   : > { %p541_p0 = pnand %p540_p13, %p534_p12 }
  0x7b   : > { %544 = shalt.err (!%p541_p0)  }
  0x7c   : > { %378 = dma.hbm_to_vmem [thread:$0]  (%p406_p6), %s104_s4, 16, %s902_s3, [#allocation2 + $0x3] }
  0x7d   : > { %s139_s17 = scalar_lea.vmem %s808_s27, 5 [#allocation5]  ;;  %s1130_s0 = smov (!%p406_p6, %s135_s0), 0 }
  0x7e   : > { %s382_s6 = scalar_select %p406_p6, [#allocation4], [#allocation30] }
  0x7f   : > { %s348_s7 = sshll.u32 %s927_s26, 4  ;;  %s148_s11 = sshll.u32 %s139_s17, 4  ;;  %s149_s11 = int_to_ptr.vmem [resolvable:$true] %s148_s11 }
  0x80   : > { %s121_s24 = scalar_lea.hbm %s1109_s1, %s348_s7  ;;  %s957_s16 = sld [smem:[%s382_s6 + %s1130_s0]] }
  0x81   : > { %s545_s30 = scalar_lea.hbm %s121_s24, 16  ;;  %p550_p8 = scmp.lt.s32.totalorder %s121_s24, %s1109_s1 }
  0x82   : > { %p546_p1 = scmp.ne.s32.totalorder %s121_s24, %s545_s30  ;;  %p551_p9 = scmp.lt.s32.totalorder %s836_s25, %s545_s30 }
  0x84   : > { %p547_p2 = pnand %p546_p1, %p406_p6  ;;  %p552_p10 = por %p551_p9, %p550_p8 }
  0x86   : > { %p548_p3 = pneg %p547_p2 }
  0x88   : > { %p553_p11 = pnand %p552_p10, %p548_p3 }
  0x8a   : > { %556 = shalt.err (!%p553_p11)  }
  0x8b   : > { %s557_s26 = scalar_lea.vmem %s132_s22, 16  ;;  %p564_p13 = scmp.lt.s32.totalorder %s132_s22, %s846_s8 }
  0x8c   : > { %p558_p12 = scmp.ne.s32.totalorder %s132_s22, %s557_s26  ;;  %p565_p0 = scmp.lt.s32.totalorder %s849_s9, %s557_s26 }
  0x8e   : > { %p559_p7 = pnand %p558_p12, %p406_p6  ;;  %p566_p1 = por %p565_p0, %p564_p13 }
  0x90   : > { %p560_p5 = pneg %p559_p7 }
  0x92   : > { %p567_p2 = pnand %p566_p1, %p560_p5 }
  0x94   : > { %570 = shalt.err (!%p567_p2)  }
  0x95   : > { %381 = dma.hbm_to_vmem [thread:$0]  (%p406_p6), %s121_s24, 16, %s132_s22, [#allocation2 + $0x4] }
  0x96   : > { %s152_s0 = sadd.s32 6, %s800_s23  ;;  %s156_s17 = scalar_lea.vmem %s808_s27, 6 [#allocation5] }
  0x97   : > { %s385_s10 = scalar_select %p406_p6, [#allocation4], [#allocation31] }
  0x98   : > { %s1132_s0 = smov (!%p406_p6, %s152_s0), 0  ;;  %s169_s6 = sadd.s32 7, %s800_s23 }
  0x99   : > { %s349_s7 = sshll.u32 %s957_s16, 4  ;;  %s153_s29 = sld [smem:[%s385_s10 + %s1132_s0]] }
  0x9a   : > { %s138_s3 = scalar_lea.hbm %s1109_s1, %s349_s7  ;;  %s165_s4 = sshll.u32 %s156_s17, 4  ;;  %s166_s4 = int_to_ptr.vmem [resolvable:$true] %s165_s4 }
  0x9b   : > { %s571_s26 = scalar_lea.hbm %s138_s3, 16  ;;  %p576_p10 = scmp.lt.s32.totalorder %s138_s3, %s1109_s1 }
  0x9c   : > { %p572_p3 = scmp.ne.s32.totalorder %s138_s3, %s571_s26  ;;  %p577_p11 = scmp.lt.s32.totalorder %s836_s25, %s571_s26 }
  0x9e   : > { %p573_p8 = pnand %p572_p3, %p406_p6  ;;  %p578_p12 = por %p577_p11, %p576_p10 }
  0xa0   : > { %p574_p9 = pneg %p573_p8 }
  0xa2   : > { %p579_p7 = pnand %p578_p12, %p574_p9 }
  0xa4   : > { %582 = shalt.err (!%p579_p7)  }
  0xa5   : > { %s583_s23 = scalar_lea.vmem %s149_s11, 16  ;;  %p590_p1 = scmp.lt.s32.totalorder %s149_s11, %s846_s8 }
  0xa6   : > { %p584_p5 = scmp.ne.s32.totalorder %s149_s11, %s583_s23  ;;  %p591_p2 = scmp.lt.s32.totalorder %s849_s9, %s583_s23 }
  0xa8   : > { %p585_p13 = pnand %p584_p5, %p406_p6  ;;  %p592_p3 = por %p591_p2, %p590_p1 }
  0xaa   : > { %p586_p0 = pneg %p585_p13 }
  0xac   : > { %p593_p8 = pnand %p592_p3, %p586_p0 }
  0xae   : > { %596 = shalt.err (!%p593_p8)  }
  0xaf   : > { %384 = dma.hbm_to_vmem [thread:$0]  (%p406_p6), %s138_s3, 16, %s149_s11, [#allocation2 + $0x5] }
  0xb0   : > { %s388_s16 = scalar_select %p406_p6, [#allocation4], [#allocation32] }
  0xb1   : > { %s1134_s6 = smov (!%p406_p6, %s169_s6), 0  ;;  %s350_s0 = sshll.u32 %s153_s29, 4 }
  0xb2   : > { %s173_s10 = scalar_lea.vmem %s808_s27, 7 [#allocation5]  ;;  %s155_s5 = scalar_lea.hbm %s1109_s1, %s350_s0 }
  0xb3   : > { %s170_s30 = sld [smem:[%s388_s16 + %s1134_s6]]  ;;  %s597_s26 = scalar_lea.hbm %s155_s5, 16 }
  0xb4   : > { %p598_p9 = scmp.ne.s32.totalorder %s155_s5, %s597_s26  ;;  %p602_p12 = scmp.lt.s32.totalorder %s155_s5, %s1109_s1 }
  0xb5   : > { %p603_p7 = scmp.lt.s32.totalorder %s836_s25, %s597_s26 }
  0xb6   : > { %p599_p10 = pnand %p598_p9, %p406_p6 }
  0xb7   : > { %p604_p5 = por %p603_p7, %p602_p12 }
  0xb8   : > { %p600_p11 = pneg %p599_p10 }
  0xba   : > { %p605_p13 = pnand %p604_p5, %p600_p11 }
  0xbc   : > { %608 = shalt.err (!%p605_p13)  }
  0xbd   : > { %s609_s11 = scalar_lea.vmem %s166_s4, 16  ;;  %p616_p3 = scmp.lt.s32.totalorder %s166_s4, %s846_s8 }
  0xbe   : > { %p610_p0 = scmp.ne.s32.totalorder %s166_s4, %s609_s11  ;;  %p617_p8 = scmp.lt.s32.totalorder %s849_s9, %s609_s11 }
  0xc0   : > { %p611_p1 = pnand %p610_p0, %p406_p6  ;;  %p618_p9 = por %p617_p8, %p616_p3 }
  0xc2   : > { %p612_p2 = pneg %p611_p1 }
  0xc4   : > { %p619_p10 = pnand %p618_p9, %p612_p2 }
  0xc6   : > { %622 = shalt.err (!%p619_p10)  }
  0xc7   : > { %387 = dma.hbm_to_vmem [thread:$0]  (%p406_p6), %s155_s5, 16, %s166_s4, [#allocation2 + $0x6] }
  0xc8   : > { %s182_s27 = sshll.u32 %s173_s10, 4  ;;  %s351_s6 = sshll.u32 %s170_s30, 4  ;;  %s183_s27 = int_to_ptr.vmem [resolvable:$true] %s182_s27 }
  0xc9   : > { %s172_s23 = scalar_lea.hbm %s1109_s1, %s351_s6 }
  0xca   : > { %s623_s16 = scalar_lea.hbm %s172_s23, 16  ;;  %p628_p5 = scmp.lt.s32.totalorder %s172_s23, %s1109_s1 }
  0xcb   : > { %p624_p11 = scmp.ne.s32.totalorder %s172_s23, %s623_s16  ;;  %p629_p13 = scmp.lt.s32.totalorder %s836_s25, %s623_s16 }
  0xcd   : > { %p625_p12 = pnand %p624_p11, %p406_p6  ;;  %p630_p0 = por %p629_p13, %p628_p5 }
  0xcf   : > { %p626_p7 = pneg %p625_p12 }
  0xd1   : > { %p631_p1 = pnand %p630_p0, %p626_p7 }
  0xd3   : > { %634 = shalt.err (!%p631_p1)  }
  0xd4   : > { %s635_s4 = scalar_lea.vmem %s183_s27, 16  ;;  %p642_p9 = scmp.lt.s32.totalorder %s183_s27, %s846_s8 }
  0xd5   : > { %p636_p2 = scmp.ne.s32.totalorder %s183_s27, %s635_s4  ;;  %p643_p10 = scmp.lt.s32.totalorder %s849_s9, %s635_s4 }
  0xd7   : > { %p637_p3 = pnand %p636_p2, %p406_p6  ;;  %p644_p11 = por %p643_p10, %p642_p9 }
  0xd9   : > { %p638_p8 = pneg %p637_p3 }
  0xdb   : > { %p645_p12 = pnand %p644_p11, %p638_p8 }
  0xdd   : > { %648 = shalt.err (!%p645_p12)  }
  0xde   : > { %390 = dma.hbm_to_vmem [thread:$0]  (%p406_p6), %s172_s23, 16, %s183_s27, [#allocation2 + $0x7] }
  0xdf   : > { %692 = dma.done.wait (%p406_p6), [#allocation2], 16 }
  0xe0   : > { %694 = vsyncadd (%p406_p6), [#allocation2], 4294967280 }
  0xe1   : > { %696 = dma.done.wait (%p406_p6), [#allocation2 + $0x1], 16 }
  0xe2   : > { %698 = vsyncadd (%p406_p6), [#allocation2 + $0x1], 4294967280 }
  0xe3   : > { %700 = dma.done.wait (%p406_p6), [#allocation2 + $0x2], 16 }
  0xe4   : > { %702 = vsyncadd (%p406_p6), [#allocation2 + $0x2], 4294967280 }
  0xe5   : > { %704 = dma.done.wait (%p406_p6), [#allocation2 + $0x3], 16 }
  0xe6   : > { %706 = vsyncadd (%p406_p6), [#allocation2 + $0x3], 4294967280 }
  0xe7   : > { %708 = dma.done.wait (%p406_p6), [#allocation2 + $0x4], 16 }
  0xe8   : > { %710 = vsyncadd (%p406_p6), [#allocation2 + $0x4], 4294967280 }
  0xe9   : > { %712 = dma.done.wait (%p406_p6), [#allocation2 + $0x5], 16 }
  0xea   : > { %714 = vsyncadd (%p406_p6), [#allocation2 + $0x5], 4294967280 }
  0xeb   : > { %716 = dma.done.wait (%p406_p6), [#allocation2 + $0x6], 16 }
  0xec   : > { %718 = vsyncadd (%p406_p6), [#allocation2 + $0x6], 4294967280 }
  0xed   : > { %720 = dma.done.wait (%p406_p6), [#allocation2 + $0x7], 16 }
  0xee   : > { %722 = vsyncadd (%p406_p6), [#allocation2 + $0x7], 4294967280  ;;  %s353_s25 = sshll.u32 %s737_s14, 7  ;;  %p1069_p7 = pnand %p406_p6, %p787_p4 }
  0xef   : > { %s223_s5 = scalar_lea.hbm %s1110_s2, %s353_s25  ;;  %s237_s26 = sand.u32 1, %s729_s12  }
  0xf0   : > { %s212_s22 = scalar_lea.sflag [#allocation6], %s49_s21  ;;  %s649_s24 = scalar_lea.vmem %s812_s28, 128 }
  0xf1   : > { %p650_p13 = scmp.ne.s32.totalorder %s812_s28, %s649_s24  ;;  %p651_p0 = pneg %p1069_p7 }
  0xf2   : > { %p658_p3 = scmp.lt.s32.totalorder %s849_s9, %s649_s24  ;;  %p1115_p8 = scmp.lt.s32.totalorder %s812_s28, %s846_s8 }
  0xf3   : > { %p652_p1 = pnand %p651_p0, %p650_p13 }
  0xf4   : > { %p659_p9 = por %p658_p3, %p1115_p8 }
  0xf5   : > { %p653_p2 = pneg %p652_p1 }
  0xf7   : > { %p660_p10 = pnand %p659_p9, %p653_p2 }
  0xf9   : > { %663 = shalt.err (!%p660_p10)
}
  0xfa   : > { %s664_s19 = scalar_lea.hbm %s223_s5, 128  ;;  %s669_s12 = scalar_lea.hbm %s1110_s2, 256 }
  0xfb   : > { %p665_p4 = scmp.ne.s32.totalorder %s223_s5, %s664_s19  ;;  %p670_p12 = scmp.lt.s32.totalorder %s223_s5, %s1110_s2 }
  0xfc   : > { %p671_p5 = scmp.lt.s32.totalorder %s669_s12, %s664_s19 }
  0xfd   : > { %p667_p6 = pnand %p665_p4, %p651_p0 }
  0xfe   : > { %p672_p13 = por %p671_p5, %p670_p12 }
  0xff   : > { %p668_p11 = pneg %p667_p6 }
 0x101   : > { %p673_p1 = pnand %p672_p13, %p668_p11 }
 0x103   : > { %676 = shalt.err (!%p673_p1)
}
 0x104   : > { %401 = dma.vmem_to_hbm [thread:$0]  (!%p1069_p7), %s812_s28, 128, %s223_s5, %s212_s22  }
 0x105   : > { %p1116_p0 = scmp.ne.s32.totalorder %s1113_s20, 0  ;;  %p1117_p2 = scmp.ge.s32.totalorder %s737_s14, 1 }
 0x106   : > { %s238_s8 = scalar_lea.sflag [#allocation6], %s237_s26 }
 0x107   : > { %p403_p3 = pnand %p1117_p2, %p1116_p0 }
 0x109   : > { %p404_p8 = pneg %p403_p3 }
 0x10b   : > { %724 = dma.done.wait (%p404_p8), %s238_s8, 128  }
 0x10c   : > { %726 = vsyncadd (%p404_p8), %s238_s8, 4294967168  ;;  %p16_p5 = scmp.ge.s32.totalorder %s776_s15, 3   ;;  %s1118_s12 = smov %s733_s13 }
 0x10d   : > { %s1119_s13 = smov %s785_s18  ;;  %s1120_s14 = smov %s776_s15 }
 0x10e   :  { %18 = sbr.rel (!%p16_p5) target bundleno = 8 (0x8), region = 105 }
 0x113   :  { %243 = vsyncpa [#allocation6], 1 }
 0x114   :  { %245 = vsyncpa [#allocation6 + $0x1], 1 }
 0x115   :  { %246 = vsyncmov [#allocation2] }
 0x118   :  { %s247_s14 = vpop.sfrf %246 }
 0x119   :  { %p356_p7 = scmp.ne.s32.totalorder %s247_s14, 0 }
 0x11b   :  { %251 = shalt.err (%p356_p7)  }
 0x11c   :  { %253 = vsyncmov [#allocation2 + $0x1] }
 0x11f   :  { %s254_s20 = vpop.sfrf %253 }
 0x120   :  { %p357_p9 = scmp.ne.s32.totalorder %s254_s20, 0 }
 0x122   :  { %258 = shalt.err (%p357_p9)  }
 0x123   :  { %260 = vsyncmov [#allocation2 + $0x2] }
 0x126   :  { %s261_s28 = vpop.sfrf %260 }
 0x127   :  { %p358_p10 = scmp.ne.s32.totalorder %s261_s28, 0 }
 0x129   :  { %265 = shalt.err (%p358_p10)  }
 0x12a   :  { %267 = vsyncmov [#allocation2 + $0x3] }
 0x12d   :  { %s268_s9 = vpop.sfrf %267 }
 0x12e   :  { %p359_p4 = scmp.ne.s32.totalorder %s268_s9, 0 }
 0x130   :  { %272 = shalt.err (%p359_p4)  }
 0x131   :  { %274 = vsyncmov [#allocation2 + $0x4] }
 0x134   :  { %s275_s15 = vpop.sfrf %274 }
 0x135   :  { %p360_p6 = scmp.ne.s32.totalorder %s275_s15, 0 }
 0x137   :  { %279 = shalt.err (%p360_p6)  }
 0x138   :  { %281 = vsyncmov [#allocation2 + $0x5] }
 0x13b   :  { %s282_s1 = vpop.sfrf %281 }
 0x13c   :  { %p361_p11 = scmp.ne.s32.totalorder %s282_s1, 0 }
 0x13e   :  { %286 = shalt.err (%p361_p11)  }
 0x13f   :  { %288 = vsyncmov [#allocation2 + $0x6] }
 0x142   :  { %s289_s2 = vpop.sfrf %288 }
 0x143   :  { %p362_p12 = scmp.ne.s32.totalorder %s289_s2, 0 }
 0x145   :  { %293 = shalt.err (%p362_p12)  }
 0x146   :  { %295 = vsyncmov [#allocation2 + $0x7] }
 0x149   :  { %s296_s13 = vpop.sfrf %295 }
 0x14a   :  { %p363_p13 = scmp.ne.s32.totalorder %s296_s13, 0 }
 0x14c   :  { %300 = shalt.err (%p363_p13)  }

</bundles_post_ra>
